<compile_context>
chip_gen: v5e
topology: v5e:2x2
jax: 0.10.0
libtpu: 0.0.40
codegen_flags: <defaults>
</compile_context>

<pallas_src>
import math
import functools

import jax
import jax.numpy as jnp
from jax import lax
from jax.experimental import pallas as pl
from jax.experimental.pallas import tpu as pltpu


def _pick_tile(dim, target):
    """Largest multiple-of-8 divisor of `dim` that is <= target.

    Falls back to the full dim (always a legal block) when no such divisor
    exists (e.g. prime or sub-8 dims).
    """
    t = min(dim, target)
    while t >= 8:
        if dim % t == 0 and t % 8 == 0:
            return t
        t -= 1
    return dim
    # TODO(synk): cdiv grid + masked tail tiles for huge prime S, where the
    #             full-S fallback tile would over-commit VMEM.


# ---------------------------------------------------------------------------
# Kernel 1: fused Q/K/V projections, tiled over (B, S), bf16 MXU operands,
# single packed (B, 3, S, H) bf16 output.
# ---------------------------------------------------------------------------
def _qkv_proj_kernel(xq_ref, xk_ref, xv_ref,
                     wq_ref, bq_ref, wk_ref, bk_ref, wv_ref, bv_ref,
                     qkv_ref):
    # wq/bq already carry the 1/sqrt(head_dim) attention scale (host-side fold).
    qkv_ref[0, 0] = (jnp.dot(xq_ref[0], wq_ref[...],
                             preferred_element_type=jnp.float32)
                     + bq_ref[...]).astype(qkv_ref.dtype)
    qkv_ref[0, 1] = (jnp.dot(xk_ref[0], wk_ref[...],
                             preferred_element_type=jnp.float32)
                     + bk_ref[...]).astype(qkv_ref.dtype)
    qkv_ref[0, 2] = (jnp.dot(xv_ref[0], wv_ref[...],
                             preferred_element_type=jnp.float32)
                     + bv_ref[...]).astype(qkv_ref.dtype)
    # TODO(synk): when input_q is input_k is input_v (self-attention), use a
    #             single x input with a concatenated (H, 3H) weight so x is
    #             streamed once and one (ts,H)@(H,3H) matmul replaces three.


# ---------------------------------------------------------------------------
# Kernel 2: flash attention (online softmax) + fused output projection.
# Grid = (B, num_q_tiles, num_kv_tiles); kv axis innermost ("arbitrary").
# m/l/acc scratch are full-width (tq, H) f32, head-broadcast along lanes, so
# all per-kv-step scratch traffic is lane-dense (one load + one store each).
# ---------------------------------------------------------------------------
def _flash_attn_kernel(q_ref, k_ref, v_ref, wo_ref, bo_ref, o_ref,
                       m_scratch, l_scratch, acc_scratch,
                       *, num_heads, head_dim):
    kv = pl.program_id(2)

    @pl.when(kv == 0)
    def _init():
        m_scratch[...] = jnp.full(m_scratch.shape, -jnp.inf, jnp.float32)
        l_scratch[...] = jnp.zeros(l_scratch.shape, jnp.float32)
        acc_scratch[...] = jnp.zeros(acc_scratch.shape, jnp.float32)

    q = q_ref[0, 0]   # (tq, H) bf16, already scaled by 1/sqrt(head_dim)
    k = k_ref[0, 0]   # (tk, H) bf16
    v = v_ref[0, 0]   # (tk, H) bf16
    tq = q.shape[0]

    m_prev = m_scratch[...]   # (tq, H) f32, one dense load
    l_prev = l_scratch[...]

    # NOTE(perf review): block-diagonal head packing of K was evaluated and
    # intentionally not applied: with tk >= 256 the MXU cost is
    # M * ceil(K/256) * ceil(N/256) passes, which is identical for num_heads
    # contraction-padded (tq,hd)@(hd,tk) matmuls and for one block-diagonal
    # (tq,G*hd)@(G*hd,G*tk) matmul, while the block-diagonal RHS costs extra
    # VPU/XLU work to assemble every kv step.
    # TODO(synk): revisit head packing for tk < the MXU column width (128/256),
    #             where it does recover wasted output columns.
    m_parts, a_parts, s_parts, pv_parts = [], [], [], []
    for h in range(num_heads):
        lo = h * head_dim
        hi = lo + head_dim
        q_h = q[:, lo:hi]                      # (tq, hd) bf16
        k_h = k[:, lo:hi]                      # (tk, hd) bf16
        v_h = v[:, lo:hi]                      # (tk, hd) bf16

        # scores (tq, tk) = q_h @ k_h^T, bf16 operands, f32 MXU accumulation.
        s = lax.dot_general(q_h, k_h, (((1,), (1,)), ((), ())),
                            preferred_element_type=jnp.float32)

        m_prev_h = m_prev[:, lo:lo + 1]                                # (tq, 1)
        m_new_h = jnp.maximum(m_prev_h, jnp.max(s, axis=-1, keepdims=True))
        alpha_h = jnp.exp(m_prev_h - m_new_h)                          # (tq, 1)
        p = jnp.exp(s - m_new_h)                                       # (tq, tk)
        sum_h = jnp.sum(p, axis=-1, keepdims=True)                     # (tq, 1)
        pv_h = jnp.dot(p.astype(v_h.dtype), v_h,
                       preferred_element_type=jnp.float32)             # (tq, hd)

        m_parts.append(jnp.broadcast_to(m_new_h, (tq, head_dim)))
        a_parts.append(jnp.broadcast_to(alpha_h, (tq, head_dim)))
        s_parts.append(jnp.broadcast_to(sum_h, (tq, head_dim)))
        pv_parts.append(pv_h)

    # Assemble full-width (tq, H) values once, then do single lane-dense
    # stores instead of num_heads masked sub-128-lane RMWs per kv step.
    m_new_full = jnp.concatenate(m_parts, axis=-1)
    alpha_full = jnp.concatenate(a_parts, axis=-1)
    sum_full = jnp.concatenate(s_parts, axis=-1)
    pv_full = jnp.concatenate(pv_parts, axis=-1)

    m_scratch[...] = m_new_full
    l_scratch[...] = alpha_full * l_prev + sum_full
    acc_scratch[...] = alpha_full * acc_scratch[...] + pv_full

    @pl.when(kv == pl.num_programs(2) - 1)
    def _finalize():
        # Deferred softmax normalization applied to the O(tq*H) accumulator.
        inv_l = pl.reciprocal(l_scratch[...], approx=True)     # (tq, H), EUP
        ctx = (acc_scratch[...] * inv_l).astype(wo_ref.dtype)  # bf16 operand
        # TODO(synk): dropout on attention probabilities omitted (eval-mode
        #             forward; nn.Dropout is identity when not training).
        out = (jnp.dot(ctx, wo_ref[...], preferred_element_type=jnp.float32)
               + bo_ref[...])
        o_ref[0] = out.astype(o_ref.dtype)


def multihead_attention(input_q, input_k, input_v, params, *, num_heads):
    B, S, H = input_q.shape
    assert input_k.shape == (B, S, H) and input_v.shape == (B, S, H)
    head_dim = H // num_heads
    assert head_dim * num_heads == H
    wq, bq, wk, bk, wv, bv, wo, bo = params
    out_dtype = input_q.dtype

    # Fold the 1/sqrt(head_dim) score scale into the Q projection in f32,
    # *before* casting to bf16 (no extra rounding step on the weights).
    scale = 1.0 / math.sqrt(head_dim)
    wq_s = wq.astype(jnp.float32) * scale
    bq_s = bq.astype(jnp.float32) * scale

    # bf16 operands for every matmul (MXU-native on v6e/v7x); f32 accumulation
    # stays via preferred_element_type.  Biases stay f32 (added to f32 accum).
    cdt = jnp.bfloat16
    xq, xk, xv = input_q.astype(cdt), input_k.astype(cdt), input_v.astype(cdt)
    wq_c, wk_c, wv_c, wo_c = (wq_s.astype(cdt), wk.astype(cdt),
                              wv.astype(cdt), wo.astype(cdt))
    bq_f, bk_f, bv_f, bo_f = (bq_s.astype(jnp.float32), bk.astype(jnp.float32),
                              bv.astype(jnp.float32), bo.astype(jnp.float32))

    # Tile targets: 512 where it divides (≈85% of HBM roofline vs ~63% at 256),
    # always multiples of 8 (or full dim) so Mosaic lowering never fails.
    ts = _pick_tile(S, 512)
    tq = _pick_tile(S, 256)
    tk = _pick_tile(S, 512)

    cparams = dict(vmem_limit_bytes=64 * 1024 * 1024)

    # ---- stage 1: fused Q/K/V projections → packed (B, 3, S, H) bf16 -----
    act_spec = pl.BlockSpec((1, ts, H), lambda b, si: (b, si, 0))
    w_spec = pl.BlockSpec((H, H), lambda b, si: (0, 0))
    b_spec = pl.BlockSpec((1, H), lambda b, si: (0, 0))
    qkv_spec = pl.BlockSpec((1, 3, ts, H), lambda b, si: (b, 0, si, 0))

    qkv = pl.pallas_call(
        _qkv_proj_kernel,
        out_shape=jax.ShapeDtypeStruct((B, 3, S, H), cdt),
        grid_spec=pltpu.PrefetchScalarGridSpec(
            num_scalar_prefetch=0,
            grid=(B, S // ts),
            in_specs=[act_spec, act_spec, act_spec,
                      w_spec, b_spec, w_spec, b_spec, w_spec, b_spec],
            out_specs=qkv_spec,
        ),
        compiler_params=pltpu.CompilerParams(
            dimension_semantics=("parallel", "parallel"), **cparams),
    )(xq, xk, xv, wq_c, bq_f, wk_c, bk_f, wv_c, bv_f)

    # ---- stage 2: flash attention + fused output projection ---------------
    kernel = functools.partial(_flash_attn_kernel,
                               num_heads=num_heads, head_dim=head_dim)

    q_spec = pl.BlockSpec((1, 1, tq, H), lambda b, qi, ki: (b, 0, qi, 0))
    k_spec = pl.BlockSpec((1, 1, tk, H), lambda b, qi, ki: (b, 1, ki, 0))
    v_spec = pl.BlockSpec((1, 1, tk, H), lambda b, qi, ki: (b, 2, ki, 0))
    wo_spec = pl.BlockSpec((H, H), lambda b, qi, ki: (0, 0))
    bo_spec = pl.BlockSpec((1, H), lambda b, qi, ki: (0, 0))
    out_spec = pl.BlockSpec((1, tq, H), lambda b, qi, ki: (b, qi, 0))
    # TODO(synk): for H >= ~2048 on v7x (64 MiB VMEM), tile wo over its output
    #             dim (extra grid axis / third pallas_call) and/or use
    #             pipeline_mode=pl.Buffered(1) on the constant-index weight
    #             spec instead of keeping the full bf16 HxH weight resident.

    return pl.pallas_call(
        kernel,
        out_shape=jax.ShapeDtypeStruct((B, S, H), out_dtype),
        grid_spec=pltpu.PrefetchScalarGridSpec(
            num_scalar_prefetch=0,
            grid=(B, S // tq, S // tk),
            in_specs=[q_spec, k_spec, v_spec, wo_spec, bo_spec],
            out_specs=out_spec,
            scratch_shapes=[
                pltpu.VMEM((tq, H), jnp.float32),   # running max (head-bcast)
                pltpu.VMEM((tq, H), jnp.float32),   # running sum (head-bcast)
                pltpu.VMEM((tq, H), jnp.float32),   # context accumulator
            ],
        ),
        compiler_params=pltpu.CompilerParams(
            dimension_semantics=("parallel", "parallel", "arbitrary"),
            **cparams),
    )(qkv, qkv, qkv, wo_c, bo_f)


def _reference(input_q, input_k, input_v, params, *, num_heads):
    wq, bq, wk, bk, wv, bv, wo, bo = params
    B, S, H = input_q.shape
    hd = H // num_heads
    q = (input_q @ wq + bq).reshape(B, S, num_heads, hd).transpose(0, 2, 1, 3)
    k = (input_k @ wk + bk).reshape(B, S, num_heads, hd).transpose(0, 2, 1, 3)
    v = (input_v @ wv + bv).reshape(B, S, num_heads, hd).transpose(0, 2, 1, 3)
    scores = jnp.einsum('bnqd,bnkd->bnqk', q, k) / math.sqrt(hd)
    probs = jax.nn.softmax(scores, axis=-1)
    ctx = jnp.einsum('bnqk,bnkd->bnqd', probs, v).transpose(0, 2, 1, 3).reshape(B, S, H)
    return ctx @ wo + bo


def init_params(key, hidden_size):
    # Deterministic synthetic weights; (in, out) layout (pre-transposed vs torch).
    keys = jax.random.split(key, 8)

    def lin(kw, kb):
        bound = 1.0 / math.sqrt(hidden_size)
        w = jax.random.uniform(kw, (hidden_size, hidden_size),
                               jnp.float32, -bound, bound)
        b = jax.random.uniform(kb, (1, hidden_size), jnp.float32, -bound, bound)
        return w, b

    wq, bq = lin(keys[0], keys[1])
    wk, bk = lin(keys[2], keys[3])
    wv, bv = lin(keys[4], keys[5])
    wo, bo = lin(keys[6], keys[7])
    return (wq, bq, wk, bk, wv, bv, wo, bo)


if __name__ == "__main__":
    B, S, H, NH = 2, 8, 32, 4
    key = jax.random.PRNGKey(0)
    k1, k2, k3, kp = jax.random.split(key, 4)
    input_q = jax.random.normal(k1, (B, S, H), jnp.float32)
    input_k = jax.random.normal(k2, (B, S, H), jnp.float32)
    input_v = jax.random.normal(k3, (B, S, H), jnp.float32)
    params = init_params(kp, H)

    out = multihead_attention(input_q, input_k, input_v, params, num_heads=NH)
    out = jax.block_until_ready(out)

    ref = _reference(input_q, input_k, input_v, params, num_heads=NH)
    assert out.shape == (B, S, H)
    # Tolerance accounts for bf16 matmul operands (f32 accumulation) and the
    # approximate (EUP) reciprocal in the deferred softmax normalization.
    assert jnp.allclose(out, ref, atol=2e-2, rtol=2e-2), (
        "mismatch vs reference, max abs diff = "
        f"{float(jnp.max(jnp.abs(out - ref)))}")
    print("KERNEL_OK")
</pallas_src>

<mosaic_0001>
module attributes {stable_mosaic.version = 11 : i64} {
  func.func @_qkv_proj_kernel(%arg0: i32, %arg1: i32, %arg2: memref<1x8x32xbf16, #tpu.memory_space<vmem>>, %arg3: memref<1x8x32xbf16, #tpu.memory_space<vmem>>, %arg4: memref<1x8x32xbf16, #tpu.memory_space<vmem>>, %arg5: memref<32x32xbf16, #tpu.memory_space<vmem>>, %arg6: memref<1x32xf32, #tpu.memory_space<vmem>>, %arg7: memref<32x32xbf16, #tpu.memory_space<vmem>>, %arg8: memref<1x32xf32, #tpu.memory_space<vmem>>, %arg9: memref<32x32xbf16, #tpu.memory_space<vmem>>, %arg10: memref<1x32xf32, #tpu.memory_space<vmem>>, %arg11: memref<1x3x8x32xbf16, #tpu.memory_space<vmem>>) attributes {dimension_semantics = [#tpu.dimension_semantics<parallel>, #tpu.dimension_semantics<parallel>], iteration_bounds = array<i64: 2, 1>, scalar_prefetch = 0 : i64, scratch_operands = 0 : i64, tpu.core_type = #tpu.core_type<tc>, window_params = [{transform_indices = @transform_0, window_bounds = array<i64: 1, 8, 32>}, {transform_indices = @transform_1, window_bounds = array<i64: 1, 8, 32>}, {transform_indices = @transform_2, window_bounds = array<i64: 1, 8, 32>}, {pipeline_mode = #tpu.pipeline_mode<synchronous>, transform_indices = @transform_3, window_bounds = array<i64: 32, 32>}, {pipeline_mode = #tpu.pipeline_mode<synchronous>, transform_indices = @transform_4, window_bounds = array<i64: 1, 32>}, {pipeline_mode = #tpu.pipeline_mode<synchronous>, transform_indices = @transform_5, window_bounds = array<i64: 32, 32>}, {pipeline_mode = #tpu.pipeline_mode<synchronous>, transform_indices = @transform_6, window_bounds = array<i64: 1, 32>}, {pipeline_mode = #tpu.pipeline_mode<synchronous>, transform_indices = @transform_7, window_bounds = array<i64: 32, 32>}, {pipeline_mode = #tpu.pipeline_mode<synchronous>, transform_indices = @transform_8, window_bounds = array<i64: 1, 32>}, {transform_indices = @transform_9, window_bounds = array<i64: 1, 3, 8, 32>}]} {
    %c0 = arith.constant 0 : index
    %c0_0 = arith.constant 0 : index
    %c0_1 = arith.constant 0 : index
    %0 = vector.load %arg2[%c0, %c0_0, %c0_1] : memref<1x8x32xbf16, #tpu.memory_space<vmem>>, vector<1x8x32xbf16>
    %1 = vector.shape_cast %0 : vector<1x8x32xbf16> to vector<8x32xbf16>
    %c0_2 = arith.constant 0 : index
    %c0_3 = arith.constant 0 : index
    %2 = vector.load %arg5[%c0_2, %c0_3] : memref<32x32xbf16, #tpu.memory_space<vmem>>, vector<32x32xbf16>
    %cst = arith.constant dense<0.000000e+00> : vector<8x32xf32>
    %3 = tpu.matmul %1, %2, %cst {dimension_numbers = #tpu.dot_dimension_numbers<[1], [0], [0], [1], [0, 0, 1, 1], [], []>} : vector<8x32xbf16>, vector<32x32xbf16>, vector<8x32xf32> -> vector<8x32xf32>
    %c0_4 = arith.constant 0 : index
    %c0_5 = arith.constant 0 : index
    %4 = vector.load %arg6[%c0_4, %c0_5] : memref<1x32xf32, #tpu.memory_space<vmem>>, vector<1x32xf32>
    %5 = vector.broadcast %4 : vector<1x32xf32> to vector<8x32xf32>
    %6 = arith.addf %3, %5 : vector<8x32xf32>
    %7 = arith.truncf %6 : vector<8x32xf32> to vector<8x32xbf16>
    %c0_6 = arith.constant 0 : index
    %c0_7 = arith.constant 0 : index
    %c0_8 = arith.constant 0 : index
    %c0_9 = arith.constant 0 : index
    %8 = vector.load %arg11[%c0_6, %c0_7, %c0_8, %c0_9] : memref<1x3x8x32xbf16, #tpu.memory_space<vmem>>, vector<1x1x8x32xbf16>
    %9 = vector.shape_cast %8 : vector<1x1x8x32xbf16> to vector<8x32xbf16>
    %10 = vector.shape_cast %7 : vector<8x32xbf16> to vector<1x1x8x32xbf16>
    tpu.vector_store %arg11[%c0_6, %c0_7, %c0_8, %c0_9], %10 {strides = array<i32>} : memref<1x3x8x32xbf16, #tpu.memory_space<vmem>>, vector<1x1x8x32xbf16>,
    %c0_10 = arith.constant 0 : index
    %c0_11 = arith.constant 0 : index
    %c0_12 = arith.constant 0 : index
    %11 = vector.load %arg3[%c0_10, %c0_11, %c0_12] : memref<1x8x32xbf16, #tpu.memory_space<vmem>>, vector<1x8x32xbf16>
    %12 = vector.shape_cast %11 : vector<1x8x32xbf16> to vector<8x32xbf16>
    %c0_13 = arith.constant 0 : index
    %c0_14 = arith.constant 0 : index
    %13 = vector.load %arg7[%c0_13, %c0_14] : memref<32x32xbf16, #tpu.memory_space<vmem>>, vector<32x32xbf16>
    %cst_15 = arith.constant dense<0.000000e+00> : vector<8x32xf32>
    %14 = tpu.matmul %12, %13, %cst_15 {dimension_numbers = #tpu.dot_dimension_numbers<[1], [0], [0], [1], [0, 0, 1, 1], [], []>} : vector<8x32xbf16>, vector<32x32xbf16>, vector<8x32xf32> -> vector<8x32xf32>
    %c0_16 = arith.constant 0 : index
    %c0_17 = arith.constant 0 : index
    %15 = vector.load %arg8[%c0_16, %c0_17] : memref<1x32xf32, #tpu.memory_space<vmem>>, vector<1x32xf32>
    %16 = vector.broadcast %15 : vector<1x32xf32> to vector<8x32xf32>
    %17 = arith.addf %14, %16 : vector<8x32xf32>
    %18 = arith.truncf %17 : vector<8x32xf32> to vector<8x32xbf16>
    %c0_18 = arith.constant 0 : index
    %c1 = arith.constant 1 : index
    %c0_19 = arith.constant 0 : index
    %c0_20 = arith.constant 0 : index
    %19 = vector.load %arg11[%c0_18, %c1, %c0_19, %c0_20] : memref<1x3x8x32xbf16, #tpu.memory_space<vmem>>, vector<1x1x8x32xbf16>
    %20 = vector.shape_cast %19 : vector<1x1x8x32xbf16> to vector<8x32xbf16>
    %21 = vector.shape_cast %18 : vector<8x32xbf16> to vector<1x1x8x32xbf16>
    tpu.vector_store %arg11[%c0_18, %c1, %c0_19, %c0_20], %21 {strides = array<i32>} : memref<1x3x8x32xbf16, #tpu.memory_space<vmem>>, vector<1x1x8x32xbf16>,
    %c0_21 = arith.constant 0 : index
    %c0_22 = arith.constant 0 : index
    %c0_23 = arith.constant 0 : index
    %22 = vector.load %arg4[%c0_21, %c0_22, %c0_23] : memref<1x8x32xbf16, #tpu.memory_space<vmem>>, vector<1x8x32xbf16>
    %23 = vector.shape_cast %22 : vector<1x8x32xbf16> to vector<8x32xbf16>
    %c0_24 = arith.constant 0 : index
    %c0_25 = arith.constant 0 : index
    %24 = vector.load %arg9[%c0_24, %c0_25] : memref<32x32xbf16, #tpu.memory_space<vmem>>, vector<32x32xbf16>
    %cst_26 = arith.constant dense<0.000000e+00> : vector<8x32xf32>
    %25 = tpu.matmul %23, %24, %cst_26 {dimension_numbers = #tpu.dot_dimension_numbers<[1], [0], [0], [1], [0, 0, 1, 1], [], []>} : vector<8x32xbf16>, vector<32x32xbf16>, vector<8x32xf32> -> vector<8x32xf32>
    %c0_27 = arith.constant 0 : index
    %c0_28 = arith.constant 0 : index
    %26 = vector.load %arg10[%c0_27, %c0_28] : memref<1x32xf32, #tpu.memory_space<vmem>>, vector<1x32xf32>
    %27 = vector.broadcast %26 : vector<1x32xf32> to vector<8x32xf32>
    %28 = arith.addf %25, %27 : vector<8x32xf32>
    %29 = arith.truncf %28 : vector<8x32xf32> to vector<8x32xbf16>
    %c0_29 = arith.constant 0 : index
    %c2 = arith.constant 2 : index
    %c0_30 = arith.constant 0 : index
    %c0_31 = arith.constant 0 : index
    %30 = vector.load %arg11[%c0_29, %c2, %c0_30, %c0_31] : memref<1x3x8x32xbf16, #tpu.memory_space<vmem>>, vector<1x1x8x32xbf16>
    %31 = vector.shape_cast %30 : vector<1x1x8x32xbf16> to vector<8x32xbf16>
    %32 = vector.shape_cast %29 : vector<8x32xbf16> to vector<1x1x8x32xbf16>
    tpu.vector_store %arg11[%c0_29, %c2, %c0_30, %c0_31], %32 {strides = array<i32>} : memref<1x3x8x32xbf16, #tpu.memory_space<vmem>>, vector<1x1x8x32xbf16>,
    return
  }
  func.func @transform_0(%arg0: i32, %arg1: i32) -> (i32, i32, i32) {
    %c0_i32 = arith.constant 0 : i32
    %c0_i32_0 = arith.constant 0 : i32
    return %arg0, %arg1, %c0_i32 : i32, i32, i32
  }
  func.func @transform_1(%arg0: i32, %arg1: i32) -> (i32, i32, i32) {
    %c0_i32 = arith.constant 0 : i32
    %c0_i32_0 = arith.constant 0 : i32
    return %arg0, %arg1, %c0_i32 : i32, i32, i32
  }
  func.func @transform_2(%arg0: i32, %arg1: i32) -> (i32, i32, i32) {
    %c0_i32 = arith.constant 0 : i32
    %c0_i32_0 = arith.constant 0 : i32
    return %arg0, %arg1, %c0_i32 : i32, i32, i32
  }
  func.func @transform_3(%arg0: i32, %arg1: i32) -> (i32, i32) {
    %c0_i32 = arith.constant 0 : i32
    %c0_i32_0 = arith.constant 0 : i32
    %c0_i32_1 = arith.constant 0 : i32
    return %c0_i32, %c0_i32_0 : i32, i32
  }
  func.func @transform_4(%arg0: i32, %arg1: i32) -> (i32, i32) {
    %c0_i32 = arith.constant 0 : i32
    %c0_i32_0 = arith.constant 0 : i32
    %c0_i32_1 = arith.constant 0 : i32
    return %c0_i32, %c0_i32_0 : i32, i32
  }
  func.func @transform_5(%arg0: i32, %arg1: i32) -> (i32, i32) {
    %c0_i32 = arith.constant 0 : i32
    %c0_i32_0 = arith.constant 0 : i32
    %c0_i32_1 = arith.constant 0 : i32
    return %c0_i32, %c0_i32_0 : i32, i32
  }
  func.func @transform_6(%arg0: i32, %arg1: i32) -> (i32, i32) {
    %c0_i32 = arith.constant 0 : i32
    %c0_i32_0 = arith.constant 0 : i32
    %c0_i32_1 = arith.constant 0 : i32
    return %c0_i32, %c0_i32_0 : i32, i32
  }
  func.func @transform_7(%arg0: i32, %arg1: i32) -> (i32, i32) {
    %c0_i32 = arith.constant 0 : i32
    %c0_i32_0 = arith.constant 0 : i32
    %c0_i32_1 = arith.constant 0 : i32
    return %c0_i32, %c0_i32_0 : i32, i32
  }
  func.func @transform_8(%arg0: i32, %arg1: i32) -> (i32, i32) {
    %c0_i32 = arith.constant 0 : i32
    %c0_i32_0 = arith.constant 0 : i32
    %c0_i32_1 = arith.constant 0 : i32
    return %c0_i32, %c0_i32_0 : i32, i32
  }
  func.func @transform_9(%arg0: i32, %arg1: i32) -> (i32, i32, i32, i32) {
    %c0_i32 = arith.constant 0 : i32
    %c0_i32_0 = arith.constant 0 : i32
    %c0_i32_1 = arith.constant 0 : i32
    return %arg0, %c0_i32, %arg1, %c0_i32_0 : i32, i32, i32, i32
  }
}

</mosaic_0001>

<bundles_post_ra>
// kernel: tpu_custom_call.1
= control target key start
LH: loop header
LB: loop body
LE: loop exit
PB: predicated region body
PF: predicated region fallthrough
CT: control target
= control target key end

     0   :  { %s1528_s0 = inlined_call_operand.hbm [shape: bf16[2,8,32], index: 0, kind: input, shape index: {}]   ;;  %s1529_s1 = inlined_call_operand.hbm [shape: bf16[2,8,32], index: 1, kind: input, shape index: {}]   ;;  %s1530_s2 = inlined_call_operand.hbm [shape: bf16[2,8,32], index: 2, kind: input, shape index: {}]   ;;  %s1531_s3 = inlined_call_operand.hbm [shape: bf16[32,32], index: 3, kind: input, shape index: {}]   ;;  %s1532_s4 = inlined_call_operand.vmem [shape: f32[1,32], index: 4, kind: input, shape index: {}]   ;;  %s1533_s5 = inlined_call_operand.hbm [shape: bf16[32,32], index: 5, kind: input, shape index: {}]   ;;  %s1534_s6 = inlined_call_operand.vmem [shape: f32[1,32], index: 6, kind: input, shape index: {}]   ;;  %s1535_s7 = inlined_call_operand.hbm [shape: bf16[32,32], index: 7, kind: input, shape index: {}]   ;;  %s1536_s8 = inlined_call_operand.vmem [shape: f32[1,32], index: 8, kind: input, shape index: {}]   ;;  %s1537_s9 = inlined_call_operand.hbm [shape: bf16[2,3,8,32], index: 9, kind: output, shape index: {}]  }
   0x1   :  { %1552 = sst [smem:[#allocation26_spill]] %s1529_s1 }
   0x2   :  { %1553 = sst [smem:[#allocation27_spill]] %s1531_s3 }
   0x3   :  { %1554 = sst [smem:[#allocation28_spill]] %s1533_s5 }
   0x4   :  { %1555 = sst [smem:[#allocation29_spill]] %s1535_s7 }
   0x5   :  { %1556 = sst [smem:[#allocation30_spill]] %s1536_s8 }
   0x6   :  { %1557 = sst [smem:[#allocation31_spill]] %s1537_s9 }
   0x7   :  { %14 = vsyncpa [#allocation3], 0 }
   0x8   :  { %16 = vsyncpa [#allocation3 + $0x1], 0 }
   0x9   :  { %17 = vsyncpa [#allocation6], 0 }
   0xa   :  { %19 = vsyncpa [#allocation6 + $0x1], 0 }
   0xb   :  { %20 = vsyncpa [#allocation9], 0 }
   0xc   :  { %21 = vsyncpa [#allocation12], 0 }
   0xd   :  { %22 = vsyncpa [#allocation4], 0 }
   0xe   :  { %24 = vsyncpa [#allocation4 + $0x1], 0  ;;  %s1298_s30 = smov 0   ;;  %s1300_s10 = smov 0  }
   0xf   :  { %s1302_s11 = smov 0   ;;  %s1304_s12 = smov 0  }
  0x10   :  { %s1306_s13 = smov 0   ;;  %s1308_s14 = smov 0  }
  0x11 LB: > { %1558 = sst [smem:[#allocation19_spill]] %s1219_s30  ;;  %s1329_s15 = sadd.s32 4294967295, %s1239_s14   ;;  %s1239_s14 = sphi %s1308_s14, %s30_s14   ;;  %s1235_s13 = sphi %s1306_s13, %s1587_s13   ;;  %s1231_s12 = sphi %s1304_s12, %s1586_s12   ;;  %s1227_s11 = sphi %s1302_s11, %s1590_s11   ;;  %s1223_s10 = sphi %s1300_s10, %s1589_s10   ;;  %s1219_s30 = sphi %s1298_s30, %s1588_s30  }
  0x12   : > { %1559 = sst [smem:[#allocation20_spill]] %s1235_s13  ;;  %p797_p0 = scmp.ge.s32.totalorder %s1239_s14, 1 }
  0x13   : > { %1560 = sst [smem:[#allocation21_spill]] %s1239_s14  ;;  %p65_p1 = scmp.eq.s32.totalorder %s1329_s15, 0 }
  0x14   : > { %p285_p2 = scmp.lt.s32.totalorder %s1239_s14, 3  ;;  %s1561_s3 = sld [smem:[#allocation27_spill]] }
  0x15   : > { %s1241_s20 = smov [#allocation8]   ;;  %p801_p6 = scmp.ge.s32.totalorder %s1239_s14, 2 }
  0x16   : > { %p1337_p3 = pnand %p797_p0, %p285_p2  ;;  %s298_s21 = sshll.u32 %s1241_s20, 4  ;;  %s299_s21 = int_to_ptr.vmem [resolvable:$true] %s298_s21 }
  0x17   : > { %s1538_s23 = smov 64   ;;  %s1540_s24 = smov 4  }
  0x18   : > { %p875_p4 = pneg %p1337_p3  ;;  %s796_s25 = sadd.s32 4294967294, %s1239_s14  }
  0x19   : > { %s42_s26 = sadd.s32 1, %s1235_s13  ;;  %s51_s27 = sadd.s32 1, %s1227_s11 }
  0x1a   : > { %s296_s18 = sshll.u32 %s1561_s3, 4  ;;  %p1345_p5 = pnand %p875_p4, %p65_p1  ;;  %s297_s18 = int_to_ptr.hbm [resolvable:$true] %s296_s18 }
  0x1b   : > { %p44_p7 = scmp.ge.s32.totalorder %s42_s26, 2  ;;  %p58_p8 = scmp.ne.s32.totalorder %s1227_s11, %s1223_s10 }
  0x1c   : > { %878 = dma.hbm_to_vmem [thread:$0]  (!%p1345_p5), %s297_s18, 256, %s299_s21, [#allocation9], %s1538_s23, %s1538_s23, %s1540_s24  }
  0x1d   : > { %p59_p9 = scmp.eq.s32.totalorder %s1239_s14, 0  ;;  %p64_p10 = scmp.ne.s32.totalorder %s1223_s10, %s1219_s30 }
  0x1e   : > { %s1592_s26 = smov (%p44_p7, %s42_s26), 0  ;;  %p272_p13 = scmp.eq.s32.totalorder %s1329_s15, 1 }
  0x1f   : > { %1564 = sst [smem:[#allocation22_spill]] %s1592_s26  ;;  %p1365_p11 = por %p59_p9, %p58_p8 }
  0x20   : > { %p1371_p12 = por %p65_p1, %p64_p10  ;;  %s46_s16 = ssub.s32 %s1235_s13, %s1592_s26 }
  0x21   : > { %p49_p0 = scmp.eq.s32.totalorder %s46_s16, 0  ;;  %p278_p2 = scmp.eq.s32.totalorder %s796_s25, 1 }
  0x22   : > { %p1378_p4 = por %p272_p13, %p58_p8  ;;  %p902_p7 = scmp.lt.s32.totalorder %s1239_s14, 2 }
  0x23   : > { %s1384_s18 = scalar_select %p49_p0, %s1227_s11, %s51_s27  }
  0x24   : > { %s1567_s17 = scalar_select %p1378_p4, 1, 0 }
  0x25   : > { %1569 = sst [smem:[#allocation24_spill]] %s1384_s18  ;;  %p1386_p9 = por %p278_p2, %p64_p10 }
  0x26   : > { %1568 = sst [smem:[#allocation23_spill]] %s1567_s17  ;;  %s1544_s21 = sand.u32 1, %s1227_s11  }
  0x27   : > { %s1570_s20 = scalar_select %p1386_p9, 1, 0 }
  0x28   : > { %s1393_s23 = sshll.u32 %s1544_s21, 2  ;;  %s1396_s24 = sshll.u32 %s1235_s13, 2 }
  0x29   : > { %1571 = sst [smem:[#allocation25_spill]] %s1570_s20  ;;  %p1400_p8 = pnand %p902_p7, %p1365_p11 }
  0x2a   : > { %s369_s27 = sand.u32 1, %s1239_s14   ;;  %s1573_s1 = sld [smem:[#allocation26_spill]] }
  0x2b   : > { %s373_s20 = scalar_lea.vmem [#allocation5], %s1393_s23  ;;  %s1410_s28 = scalar_lea.sflag [#allocation6], %s369_s27 }
  0x2c   : > { %s382_s21 = sshll.u32 %s373_s20, 4  ;;  %s1574_s5 = sld [smem:[#allocation28_spill]]  ;;  %s383_s21 = int_to_ptr.vmem [resolvable:$true] %s382_s21 }
  0x2d   : > { %s1244_s3 = smov [#allocation10]   ;;  %s1575_s7 = sld [smem:[#allocation29_spill]] }
  0x2e   : > { %s1576_s27 = smov 4   ;;  %s1577_s17 = smov 64  }
  0x2f   : > { %s1245_s30 = smov [#allocation11]   ;;  %s353_s20 = scalar_lea.vmem [#allocation2], %s1393_s23 }
  0x30   : > { %s378_s26 = scalar_lea.hbm %s1573_s1, %s1396_s24  ;;  %s332_s13 = sshll.u32 %s1245_s30, 4  ;;  %s333_s13 = int_to_ptr.vmem [resolvable:$true] %s332_s13 }
  0x31   : > { %s380_s18 = sshll.u32 %s378_s26, 4  ;;  %s315_s26 = sshll.u32 %s1244_s3, 4  ;;  %s381_s18 = int_to_ptr.hbm [resolvable:$true] %s380_s18  ;;  %s316_s26 = int_to_ptr.vmem [resolvable:$true] %s315_s26 }
  0x32   : > { %891 = dma.hbm_to_vmem [thread:$0]  (!%p1400_p8), %s381_s18, 64, %s383_s21, %s1410_s28  }
  0x33   : > { %s313_s14 = sshll.u32 %s1574_s5, 4  ;;  %s330_s1 = sshll.u32 %s1575_s7, 4  ;;  %s314_s14 = int_to_ptr.hbm [resolvable:$true] %s313_s14  ;;  %s331_s1 = int_to_ptr.hbm [resolvable:$true] %s330_s1 }
  0x34   : > { %881 = dma.hbm_to_vmem [thread:$0]  (!%p1345_p5), %s314_s14, 256, %s316_s26, [#allocation9], %s1577_s17, %s1577_s17, %s1576_s27  }
  0x35   : > { %884 = dma.hbm_to_vmem [thread:$0]  (!%p1345_p5), %s331_s1, 256, %s333_s13, [#allocation12], %s1577_s17, %s1577_s17, %s1576_s27  }
  0x36   : > { %s358_s3 = scalar_lea.hbm %s1528_s0, %s1396_s24  ;;  %s362_s16 = sshll.u32 %s353_s20, 4  ;;  %s363_s16 = int_to_ptr.vmem [resolvable:$true] %s362_s16 }
  0x37   : > { %s360_s5 = sshll.u32 %s358_s3, 4  ;;  %s1578_s14 = sand.u32 1, %s1227_s11   ;;  %s361_s5 = int_to_ptr.hbm [resolvable:$true] %s360_s5 }
  0x38   : > { %s350_s26 = scalar_lea.sflag [#allocation3], %s1578_s14  ;;  %s398_s7 = scalar_lea.hbm %s1530_s2, %s1396_s24 }
  0x39   : > { %888 = dma.hbm_to_vmem [thread:$0]  (!%p1400_p8), %s361_s5, 64, %s363_s16, %s350_s26  }
  0x3a   : > { %s393_s8 = scalar_lea.vmem [#allocation7], %s1393_s23  ;;  %s400_s1 = sshll.u32 %s398_s7, 4  ;;  %s401_s1 = int_to_ptr.hbm [resolvable:$true] %s400_s1 }
  0x3b   : > { %s402_s9 = sshll.u32 %s393_s8, 4  ;;  %411 = sbr.rel (%p1337_p3) target bundleno = 221 (0xdd), region = 56  ;;  %s403_s9 = int_to_ptr.vmem [resolvable:$true] %s402_s9 }
  0x3c   : > { %894 = dma.hbm_to_vmem [thread:$0]  (!%p1400_p8), %s401_s1, 64, %s403_s9, %s1410_s28  }
  0x3d   : > { %s1451_s17 = sand.u32 (!%p1337_p3), 1, %s1223_s10  }
  0x3e   : > { %s1454_s5 = sshll.u32 (!%p1337_p3), %s1451_s17, 2  ;;  %s414_s24 = scalar_lea.sflag (!%p1337_p3), [#allocation3], %s1451_s17 }
  0x3f   : > { %s417_s23 = scalar_lea.vmem (!%p1337_p3), [#allocation2], %s1454_s5 }
  0x40   : > { %1198 = dma.done.wait (%p1371_p12), %s414_s24, 64  }
  0x41   : > { %1200 = vsyncadd (%p1371_p12), %s414_s24, 4294967232  ;;  %s423_s7 = sand.u32 1, %s1329_s15   ;;  %s427_s9 = scalar_lea.vmem [#allocation5], %s1454_s5 }
  0x42   : > { %s424_s8 = scalar_lea.sflag [#allocation6], %s423_s7 }
  0x43   : > { %1202 = dma.done.wait (%p1371_p12), %s424_s8, 128  }
  0x44   : > { %1204 = vsyncadd (%p1371_p12), %s424_s8, 4294967168  ;;  %s437_s19 = scalar_lea.vmem [#allocation7], %s1454_s5 }
  0x45   : > { %1206 = dma.done.wait (%p65_p1), [#allocation9], 512  }
  0x46   : > { %1208 = vsyncadd (%p65_p1), [#allocation9], 4294966784 }
  0x47   : > { %1210 = dma.done.wait (%p65_p1), [#allocation12], 256  }
  0x48   : > { %1212 = vsyncadd (%p65_p1), [#allocation12], 4294967040  ;;  %v848_v0 = vld [vmem:[#allocation8 + $0x8] sm:$0xff]  ;;  %v850_v1 = vld [vmem:[#allocation10 + $0x8] sm:$0xff]  ;;  %vm520_vm0 = vcmask 261120   ;;  %s853_s27 = smul.u32 12, %s1451_s17 }
  0x49   : > { %v852_v2 = vld [vmem:[#allocation11 + $0x8] sm:$0xff]  ;;  %530 = vmatpush.bf16.msra.mxu0 %v848_v0  ;;  %570 = vmatpush.bf16.msra.mxu1 %v850_v1  ;;  %v847_v3 = vld [vmem:[#allocation8] sm:$0xff]  ;;  %v849_v4 = vld [vmem:[#allocation10] sm:$0xff]  ;;  %s854_s13 = smul.u32 12, %s1231_s12  ;;  %vm538_vm1 = vcmask 257024   ;;  %s1579_s3 = sld [smem:[#allocation31_spill]] }
  0x4a   : > { %610 = vmatpush.bf16.msra.mxu2 %v852_v2  ;;  %v851_v5 = vld [vmem:[#allocation11] sm:$0xff]  ;;  %v499_v6 = vld [vmem:[%s417_s23] sm:$0xf]  ;;  %v540_v7 = vld [vmem:[%s427_s9] sm:$0xf]  ;;  %s1580_s26 = sld [smem:[#allocation30_spill]] }
  0x4b   : > { %v580_v8 = vld [vmem:[%s437_s19] sm:$0xf]  ;;  %v962_v9 = vld [vmem:[%s1532_s4] ss:$0 sm:$0xff]  ;;  %s497_s22 = scalar_lea.vmem [#allocation13], %s853_s27  ;;  %s621_s5 = scalar_lea.sflag [#allocation4], %s1451_s17 }
  0x4c   : > { %v963_v10 = vld [vmem:[%s1534_s6] ss:$0 sm:$0xff]  ;;  %s634_s12 = sshll.u32 %s497_s22, 4  ;;  %s635_s12 = int_to_ptr.vmem [resolvable:$true] %s634_s12 }
  0x4d   : > { %531 = vmatpush.bf16.msra.mxu0 %v847_v3  ;;  %571 = vmatpush.bf16.msra.mxu1 %v849_v4 }
  0x4e   : > { %611 = vmatpush.bf16.msra.mxu2 %v851_v5 }
  0x4f   : > { %s633_s20 = scalar_lea.hbm %s1579_s3, %s854_s13  ;;  %s1165_s9 = scalar_lea.hbm %s1579_s3, 24 }
  0x50   : > { %823 = vmatmul.msk.bf16.vlgmr.msra.gmra.mxu0 %vm520_vm0, %v499_v6  ;;  %832 = vmatmul.msk.bf16.vlgmr.msra.gmra.mxu1 %vm520_vm0, %v540_v7  ;;  %v964_v17 = vld [vmem:[%s1580_s26] ss:$0 sm:$0xff]  ;;  %s636_s1 = sshll.u32 %s633_s20, 4  ;;  %s637_s1 = int_to_ptr.hbm [resolvable:$true] %s636_s1 }
  0x51   : > { %842 = vmatmul.msk.bf16.vlgmr.msra.gmra.mxu2 %vm520_vm0, %v580_v8  ;;  %s1159_s24 = sshra.s32 %s637_s1, 4  ;;  %s1160_s24 = int_to_ptr.hbm [resolvable:$true] %s1159_s24 }
  0x52   : > { %s1161_s23 = scalar_lea.hbm %s1160_s24, 12  ;;  %p1166_p10 = scmp.lt.s32.totalorder %s1160_s24, %s1579_s3 }
  0x53   : > { %p1162_p1 = scmp.ne.s32.totalorder %s1160_s24, %s1161_s23  ;;  %p1167_p11 = scmp.lt.s32.totalorder %s1165_s9, %s1161_s23 }
  0x55   : > { %p1163_p3 = pnand %p1162_p1, %p1378_p4  ;;  %p1168_p12 = por %p1167_p11, %p1166_p10 }
  0x57   : > { %p1164_p5 = pneg %p1163_p3 }
  0x59   : > { %p1169_p13 = pnand %p1168_p12, %p1164_p5 }
  0xcd   : > { %v533_v11 = vpop.f32.mrf.mxu0  ;;  %v573_v12 = vpop.f32.mrf.mxu1 }
  0xce   : > { %v534_v13 = vadd.f32 %v962_v9, %v533_v11  ;;  %v574_v14 = vadd.f32 %v963_v10, %v573_v12 }
  0xd0   : > { %v537_v15 = vpack.c.bf16 %v534_v13, %v534_v13  ;;  %v577_v16 = vpack.c.bf16 %v574_v14, %v574_v14 }
  0xd2   : > { %539 = vst.msk [vmem:[%s497_s22] sm:$0xf] %vm538_vm1, %v537_v15 }
  0xd3   : > { %833 = vst.msk [vmem:[%s497_s22 + $0x4] sm:$0xf] %vm538_vm1, %v577_v16 }
  0xd4   : > { %v613_v18 = vpop.f32.mrf.mxu2 }
  0xd5   : > { %v614_v19 = vadd.f32 %v964_v17, %v613_v18  ;;  %v535_v20 = vpop.f32.mrf.mxu0  ;;  %v575_v21 = vpop.f32.mrf.mxu1 }
  0xd7   : > { %v617_v22 = vpack.c.bf16 %v614_v19, %v614_v19 }
  0xd9   : > { %843 = vst.msk [vmem:[%s497_s22 + $0x8] sm:$0xf] %vm538_vm1, %v617_v22 }
  0xda   : > { %1172 = shalt.err (!%p1169_p13)
}
  0xdb   : > { %s1246_s17 = smov 64   ;;  %s1247_s29 = smov 4  }
  0xdc   : > { %873 = dma.vmem_to_hbm [thread:$0]  (%p1378_p4), %s635_s12, 192, %s637_s1, %s621_s5, %s1246_s17, %s1246_s17, %s1247_s29   ;;  %v615_v23 = vpop.f32.mrf.mxu2 }
  0xdd PF: > { %s1582_s25 = sld [smem:[#allocation19_spill]]  ;;  %p896_p0 = pnand %p801_p6, %p1386_p9 }
  0xde   : > { %s1584_s27 = sld [smem:[#allocation21_spill]] }
  0xdf   : > { %p897_p2 = pneg %p896_p0 }
  0xe3   : > { %s651_s13 = sand.u32 1, %s1582_s25  }
  0xe4   : > { %s652_s18 = scalar_lea.sflag [#allocation4], %s651_s13 }
  0xe5   : > { %1214 = dma.done.wait (%p897_p2), %s652_s18, 192  }
  0xe6   : > { %1216 = vsyncadd (%p897_p2), %s652_s18, 4294967104  ;;  %s30_s14 = sadd.s32 1, %s1584_s27   ;;  %s1585_s21 = sld [smem:[#allocation24_spill]] }
  0xe7   : > { %p27_p7 = scmp.ge.s32.totalorder %s30_s14, 4   ;;  %s1586_s12 = sld [smem:[#allocation20_spill]] }
  0xe8   : > { %s1587_s13 = sld [smem:[#allocation22_spill]]  ;;  %s1588_s30 = smov %s1223_s10 }
  0xe9   : > { %s1589_s10 = smov %s1227_s11  ;;  %29 = sbr.rel (!%p27_p7) target bundleno = 17 (0x11), region = 139 }
  0xec   : > { %s1590_s11 = smov %s1585_s21 }
  0xee   :  { %658 = vsyncpa [#allocation3], 1 }
  0xef   :  { %660 = vsyncpa [#allocation3 + $0x1], 1 }
  0xf0   :  { %661 = vsyncpa [#allocation6], 1 }
  0xf1   :  { %663 = vsyncpa [#allocation6 + $0x1], 1 }
  0xf2   :  { %664 = vsyncpa [#allocation9], 1 }
  0xf3   :  { %665 = vsyncpa [#allocation12], 1 }
  0xf4   :  { %666 = vsyncpa [#allocation4], 1 }
  0xf5   :  { %668 = vsyncpa [#allocation4 + $0x1], 1 }

</bundles_post_ra>
